<compile_context>
chip_gen: v7x
topology: tpu7x:2x2x1
jax: 0.10.0
libtpu: 0.0.40
codegen_flags: <defaults>
</compile_context>

<pallas_src>
import jax
import jax.numpy as jnp
from jax.experimental import pallas as pl
from jax.experimental.pallas import tpu as pltpu


def _round_up(x: int, m: int) -> int:
    return ((x + m - 1) // m) * m


def label_encoder_kernel(z_ref, w1_ref, b1_ref, w2_ref, b2_ref, o_ref):
    # z_ref:  [TB, Ep]   w1_ref: [Ep, Hp]   b1_ref: [1, Hp] (f32)
    # w2_ref: [Hp, Ep]   b2_ref: [1, Ep] (f32)   o_ref: [TB, Ep]
    z = z_ref[...]  # fed straight to the MXU in its stored dtype

    # fc1 + ReLU (f32 accumulation on the MXU; bias already f32)
    h = jnp.dot(z, w1_ref[...], preferred_element_type=jnp.float32)
    h = jnp.maximum(h + b1_ref[...], 0.0)

    # fc2 + bias + skip, all in f32; single cast at the final store.
    h = h.astype(w2_ref.dtype)
    out = jnp.dot(h, w2_ref[...], preferred_element_type=jnp.float32)
    out = out + b2_ref[...] + z.astype(jnp.float32)
    o_ref[...] = out.astype(o_ref.dtype)


def prepare_params(w1_t, b1, w2_t, b2, *, param_dtype=None):
    """Pad parameters to lane-dense (multiples of 128) shapes ONCE (at init).

    w1_t: [E, H] (already transposed to [in, out]), b1: [H],
    w2_t: [H, E], b2: [E].  Returns (padded_params, (E, H)).
    Biases are stored f32 so the kernel does no per-tile bias casts.
    """
    E, H = w1_t.shape
    Ep = _round_up(max(E, 128), 128)
    Hp = _round_up(max(H, 128), 128)
    wd = param_dtype if param_dtype is not None else w1_t.dtype

    w1p = jnp.zeros((Ep, Hp), wd).at[:E, :H].set(w1_t.astype(wd))
    b1p = jnp.zeros((1, Hp), jnp.float32).at[0, :H].set(b1.astype(jnp.float32))
    w2p = jnp.zeros((Hp, Ep), wd).at[:H, :E].set(w2_t.astype(wd))
    b2p = jnp.zeros((1, Ep), jnp.float32).at[0, :E].set(b2.astype(jnp.float32))
    return (w1p, b1p, w2p, b2p), (E, H)


def label_encoder(z, padded_params, dims, *, block_b: int = 512):
    """z: [B, E]; padded_params/dims from prepare_params()."""
    w1p, b1p, w2p, b2p = padded_params
    E, H = dims
    B = z.shape[0]
    assert z.shape[1] == E
    Ep, Hp = w1p.shape
    out_dtype = z.dtype

    # Pad z's lane (feature) dim only if E is not already lane-dense.
    if E != Ep:
        zp = jnp.zeros((B, Ep), z.dtype).at[:, :E].set(z)
    else:
        zp = z
    # Match the MXU operand dtype of the weights (no-op for f32 params).
    if zp.dtype != w1p.dtype:
        zp = zp.astype(w1p.dtype)

    # Batch tile: multiple of 8, >= 2 grid steps when B allows (v7x megacore),
    # never round the batch itself up (Pallas masks the partial edge block).
    TB = min(block_b, max(8, _round_up(pl.cdiv(B, 2), 8)))
    grid_b = pl.cdiv(B, TB)

    # Cost estimate from the TRUE (unpadded) problem size.
    z_item = jnp.dtype(out_dtype).itemsize
    w_item = jnp.dtype(w1p.dtype).itemsize
    flops = 4 * B * E * H  # two matmuls
    bytes_accessed = z_item * (2 * B * E) + w_item * (2 * E * H) + 4 * (E + H)

    resident = dict(pipeline_mode=pl.Buffered(1))  # constant index_map inputs

    out_padded = pl.pallas_call(
        label_encoder_kernel,
        out_shape=jax.ShapeDtypeStruct((B, Ep), out_dtype),
        grid=(grid_b,),
        in_specs=[
            pl.BlockSpec((TB, Ep), lambda i: (i, 0)),              # z: batch-tiled
            pl.BlockSpec((Ep, Hp), lambda i: (0, 0), **resident),  # w1 resident
            pl.BlockSpec((1, Hp), lambda i: (0, 0), **resident),   # b1 resident
            pl.BlockSpec((Hp, Ep), lambda i: (0, 0), **resident),  # w2 resident
            pl.BlockSpec((1, Ep), lambda i: (0, 0), **resident),   # b2 resident
        ],
        out_specs=pl.BlockSpec((TB, Ep), lambda i: (i, 0)),
        compiler_params=pltpu.CompilerParams(
            dimension_semantics=("parallel",),
            vmem_limit_bytes=64 * 1024 * 1024,
        ),
        cost_estimate=pl.CostEstimate(
            flops=flops, transcendentals=0, bytes_accessed=bytes_accessed),
    )(zp, w1p, b1p, w2p, b2p)

    return out_padded[:, :E] if E != Ep else out_padded


def init_params(key, embed_dim):
    """Deterministic init mimicking nn.Linear's uniform(-1/sqrt(fan_in), ...)."""
    hidden_dim = embed_dim
    k1, k2, k3, k4 = jax.random.split(key, 4)
    bound1 = 1.0 / (embed_dim ** 0.5)
    bound2 = 1.0 / (hidden_dim ** 0.5)
    # Stored already transposed to [in, out].
    w1_t = jax.random.uniform(k1, (embed_dim, hidden_dim), jnp.float32,
                              -bound1, bound1)
    b1 = jax.random.uniform(k2, (hidden_dim,), jnp.float32, -bound1, bound1)
    w2_t = jax.random.uniform(k3, (hidden_dim, embed_dim), jnp.float32,
                              -bound2, bound2)
    b2 = jax.random.uniform(k4, (embed_dim,), jnp.float32, -bound2, bound2)
    return w1_t, b1, w2_t, b2


if __name__ == "__main__":
    key = jax.random.PRNGKey(0)
    B, E = 8, 32  # batch, embed_dim

    k_z, k_p = jax.random.split(key)
    z = jax.random.normal(k_z, (B, E), jnp.float32)
    w1_t, b1, w2_t, b2 = init_params(k_p, E)

    # Pure-JAX reference (matches PyTorch forward semantics).
    ref = jnp.maximum(z @ w1_t + b1, 0.0) @ w2_t + b2 + z

    # f32 parameters (exact PyTorch semantics).
    params_f32, dims = prepare_params(w1_t, b1, w2_t, b2)
    out = jax.block_until_ready(label_encoder(z, params_f32, dims))
    assert out.shape == (B, E)
    assert jnp.allclose(out, ref, atol=1e-4, rtol=1e-4)

    # bf16 parameters (mixed precision: bf16 MXU operands, f32 accumulation).
    params_bf16, dims = prepare_params(w1_t, b1, w2_t, b2,
                                       param_dtype=jnp.bfloat16)
    out_bf16 = jax.block_until_ready(label_encoder(z, params_bf16, dims))
    assert out_bf16.shape == (B, E)
    assert jnp.allclose(out_bf16, ref, atol=5e-2, rtol=5e-2)

    print("KERNEL_OK")
</pallas_src>

<mosaic_0001>
module attributes {stable_mosaic.version = 11 : i64} {
  func.func @label_encoder_kernel(%arg0: i32, %arg1: memref<8x128xf32, #tpu.memory_space<vmem>>, %arg2: memref<128x128xf32, #tpu.memory_space<vmem>>, %arg3: memref<1x128xf32, #tpu.memory_space<vmem>>, %arg4: memref<128x128xf32, #tpu.memory_space<vmem>>, %arg5: memref<1x128xf32, #tpu.memory_space<vmem>>, %arg6: memref<8x128xf32, #tpu.memory_space<vmem>>) attributes {dimension_semantics = [#tpu.dimension_semantics<parallel>], iteration_bounds = array<i64: 1>, scalar_prefetch = 0 : i64, scratch_operands = 0 : i64, tpu.core_type = #tpu.core_type<tc>, window_params = [{transform_indices = @transform_0, window_bounds = array<i64: 8, 128>}, {pipeline_mode = #tpu.pipeline_mode<synchronous>, transform_indices = @transform_1, window_bounds = array<i64: 128, 128>}, {pipeline_mode = #tpu.pipeline_mode<synchronous>, transform_indices = @transform_2, window_bounds = array<i64: 1, 128>}, {pipeline_mode = #tpu.pipeline_mode<synchronous>, transform_indices = @transform_3, window_bounds = array<i64: 128, 128>}, {pipeline_mode = #tpu.pipeline_mode<synchronous>, transform_indices = @transform_4, window_bounds = array<i64: 1, 128>}, {transform_indices = @transform_5, window_bounds = array<i64: 8, 128>}]} {
    %c0 = arith.constant 0 : index
    %c0_0 = arith.constant 0 : index
    %0 = vector.load %arg1[%c0, %c0_0] : memref<8x128xf32, #tpu.memory_space<vmem>>, vector<8x128xf32>
    %c0_1 = arith.constant 0 : index
    %c0_2 = arith.constant 0 : index
    %1 = vector.load %arg2[%c0_1, %c0_2] : memref<128x128xf32, #tpu.memory_space<vmem>>, vector<128x128xf32>
    %cst = arith.constant dense<0.000000e+00> : vector<8x128xf32>
    %2 = tpu.matmul %0, %1, %cst {dimension_numbers = #tpu.dot_dimension_numbers<[1], [0], [0], [1], [0, 0, 1, 1], [], []>} : vector<8x128xf32>, vector<128x128xf32>, vector<8x128xf32> -> vector<8x128xf32>
    %c0_3 = arith.constant 0 : index
    %c0_4 = arith.constant 0 : index
    %3 = vector.load %arg3[%c0_3, %c0_4] : memref<1x128xf32, #tpu.memory_space<vmem>>, vector<1x128xf32>
    %4 = vector.broadcast %3 : vector<1x128xf32> to vector<8x128xf32>
    %5 = arith.addf %2, %4 : vector<8x128xf32>
    %cst_5 = arith.constant 0.000000e+00 : f32
    %6 = vector.broadcast %cst_5 : f32 to vector<8x128xf32>
    %7 = arith.maximumf %5, %6 : vector<8x128xf32>
    %c0_6 = arith.constant 0 : index
    %c0_7 = arith.constant 0 : index
    %8 = vector.load %arg4[%c0_6, %c0_7] : memref<128x128xf32, #tpu.memory_space<vmem>>, vector<128x128xf32>
    %cst_8 = arith.constant dense<0.000000e+00> : vector<8x128xf32>
    %9 = tpu.matmul %7, %8, %cst_8 {dimension_numbers = #tpu.dot_dimension_numbers<[1], [0], [0], [1], [0, 0, 1, 1], [], []>} : vector<8x128xf32>, vector<128x128xf32>, vector<8x128xf32> -> vector<8x128xf32>
    %c0_9 = arith.constant 0 : index
    %c0_10 = arith.constant 0 : index
    %10 = vector.load %arg5[%c0_9, %c0_10] : memref<1x128xf32, #tpu.memory_space<vmem>>, vector<1x128xf32>
    %11 = vector.broadcast %10 : vector<1x128xf32> to vector<8x128xf32>
    %12 = arith.addf %9, %11 : vector<8x128xf32>
    %13 = arith.addf %12, %0 : vector<8x128xf32>
    %c0_11 = arith.constant 0 : index
    %c0_12 = arith.constant 0 : index
    %14 = vector.load %arg6[%c0_11, %c0_12] : memref<8x128xf32, #tpu.memory_space<vmem>>, vector<8x128xf32>
    tpu.vector_store %arg6[%c0_11, %c0_12], %13 {strides = array<i32>} : memref<8x128xf32, #tpu.memory_space<vmem>>, vector<8x128xf32>,
    return
  }
  func.func @transform_0(%arg0: i32) -> (i32, i32) {
    %c0_i32 = arith.constant 0 : i32
    %c0_i32_0 = arith.constant 0 : i32
    return %arg0, %c0_i32 : i32, i32
  }
  func.func @transform_1(%arg0: i32) -> (i32, i32) {
    %c0_i32 = arith.constant 0 : i32
    %c0_i32_0 = arith.constant 0 : i32
    %c0_i32_1 = arith.constant 0 : i32
    return %c0_i32, %c0_i32_0 : i32, i32
  }
  func.func @transform_2(%arg0: i32) -> (i32, i32) {
    %c0_i32 = arith.constant 0 : i32
    %c0_i32_0 = arith.constant 0 : i32
    %c0_i32_1 = arith.constant 0 : i32
    return %c0_i32, %c0_i32_0 : i32, i32
  }
  func.func @transform_3(%arg0: i32) -> (i32, i32) {
    %c0_i32 = arith.constant 0 : i32
    %c0_i32_0 = arith.constant 0 : i32
    %c0_i32_1 = arith.constant 0 : i32
    return %c0_i32, %c0_i32_0 : i32, i32
  }
  func.func @transform_4(%arg0: i32) -> (i32, i32) {
    %c0_i32 = arith.constant 0 : i32
    %c0_i32_0 = arith.constant 0 : i32
    %c0_i32_1 = arith.constant 0 : i32
    return %c0_i32, %c0_i32_0 : i32, i32
  }
  func.func @transform_5(%arg0: i32) -> (i32, i32) {
    %c0_i32 = arith.constant 0 : i32
    %c0_i32_0 = arith.constant 0 : i32
    return %arg0, %c0_i32 : i32, i32
  }
}

</mosaic_0001>

<bundles_post_ra>
// kernel: tpu_custom_call.1
= control target key start
LH: loop header
LB: loop body
LE: loop exit
PB: predicated region body
PF: predicated region fallthrough
CT: control target
= control target key end

     0   :  { %10 = vsyncpa [#allocation3], 0  ;;  %s724_s0 = inlined_call_operand.hbm [shape: f32[8,128], index: 0, kind: input, shape index: {}]   ;;  %s725_s1 = inlined_call_operand.hbm [shape: f32[128,128], index: 1, kind: input, shape index: {}]   ;;  %s726_s2 = inlined_call_operand.hbm [shape: f32[1,128], index: 2, kind: input, shape index: {}]   ;;  %s727_s3 = inlined_call_operand.hbm [shape: f32[128,128], index: 3, kind: input, shape index: {}]   ;;  %s728_s4 = inlined_call_operand.hbm [shape: f32[1,128], index: 4, kind: input, shape index: {}]   ;;  %s729_s5 = inlined_call_operand.hbm [shape: f32[8,128], index: 5, kind: output, shape index: {}]  }
   0x1   :  { %11 = vsyncpa [#allocation6], 0 }
   0x2   :  { %12 = vsyncpa [#allocation9], 0 }
   0x3   :  { %13 = vsyncpa [#allocation4], 0  ;;  %s595_s18 = smov [#allocation5]   ;;  %s455_s22 = scalar_lea.hbm %s725_s1, 2048 }
   0x4   :  { %s29_s19 = sshll.u32 %s595_s18, 4  ;;  %p456_p0 = scmp.ne.s32.totalorder %s725_s1, %s455_s22  ;;  %s30_s19 = int_to_ptr.vmem [resolvable:$true] %s29_s19 }
   0x5   :  { %p459_p1 = scmp.lt.u32.totalorder %s455_s22, %s725_s1 }
   0x7   :  { %p461_p2 = pnand %p459_p1, %p456_p0 }
   0x9   :  { %464 = shalt.err (!%p461_p2)
}
   0xa   :  { %s465_s27 = scalar_lea.vmem %s30_s19, 2048  ;;  %p470_p4 = scmp.lt.s32.totalorder %s30_s19, %s30_s19 }
   0xb   :  { %p466_p3 = scmp.ne.s32.totalorder %s30_s19, %s465_s27  ;;  %p471_p5 = scmp.lt.s32.totalorder %s465_s27, %s465_s27 }
   0xd   :  { %p472_p6 = por %p471_p5, %p470_p4 }
   0xf   :  { %p473_p7 = pnand %p472_p6, %p466_p3 }
  0x11   :  { %476 = shalt.err (!%p473_p7)
}
  0x12   :  { %s596_s28 = smov 128   ;;  %s597_s29 = smov 8  }
  0x13   :  { %35 = dma.hbm_to_vmem [thread:$0]  %s725_s1, 2048, %s30_s19, [#allocation6], %s596_s28, %s596_s28, %s597_s29  }
  0x14   :  { %s598_s7 = smov [#allocation8]   ;;  %s599_s9 = smov [#allocation2]  }
  0x15   :  { %s51_s8 = sshll.u32 %s598_s7, 4  ;;  %s20_s10 = sshll.u32 %s599_s9, 4  ;;  %s52_s8 = int_to_ptr.vmem [resolvable:$true] %s51_s8  ;;  %s21_s10 = int_to_ptr.vmem [resolvable:$true] %s20_s10 }
  0x16   :  { %s477_s13 = scalar_lea.hbm %s727_s3, 2048 }
  0x17   :  { %p478_p8 = scmp.ne.s32.totalorder %s727_s3, %s477_s13  ;;  %p481_p9 = scmp.lt.u32.totalorder %s477_s13, %s727_s3 }
  0x19   :  { %p483_p10 = pnand %p481_p9, %p478_p8 }
  0x1b   :  { %486 = shalt.err (!%p483_p10)
}
  0x1c   :  { %s487_s1 = scalar_lea.vmem %s52_s8, 2048  ;;  %p492_p12 = scmp.lt.s32.totalorder %s52_s8, %s52_s8 }
  0x1d   :  { %p488_p11 = scmp.ne.s32.totalorder %s52_s8, %s487_s1  ;;  %p493_p13 = scmp.lt.s32.totalorder %s487_s1, %s487_s1 }
  0x1f   :  { %p494_p0 = por %p493_p13, %p492_p12 }
  0x21   :  { %p495_p1 = pnand %p494_p0, %p488_p11 }
  0x23   :  { %498 = shalt.err (!%p495_p1)
}
  0x24   :  { %57 = dma.hbm_to_vmem [thread:$0]  %s727_s3, 2048, %s52_s8, [#allocation9], %s596_s28, %s596_s28, %s597_s29  }
  0x25   :  { %s499_s22 = scalar_lea.hbm %s724_s0, 128 }
  0x26   :  { %p500_p2 = scmp.ne.s32.totalorder %s724_s0, %s499_s22  ;;  %p503_p3 = scmp.lt.u32.totalorder %s499_s22, %s724_s0 }
  0x28   :  { %p505_p4 = pnand %p503_p3, %p500_p2 }
  0x2a   :  { %508 = shalt.err (!%p505_p4)
}
  0x2b   :  { %s509_s27 = scalar_lea.vmem %s21_s10, 128  ;;  %p514_p6 = scmp.lt.s32.totalorder %s21_s10, %s21_s10 }
  0x2c   :  { %p510_p5 = scmp.ne.s32.totalorder %s21_s10, %s509_s27  ;;  %p515_p7 = scmp.lt.s32.totalorder %s509_s27, %s509_s27 }
  0x2e   :  { %p516_p8 = por %p515_p7, %p514_p6 }
  0x30   :  { %p517_p9 = pnand %p516_p8, %p510_p5 }
  0x32   :  { %520 = shalt.err (!%p517_p9)
}
  0x33   :  { %23 = dma.hbm_to_vmem [thread:$0]  %s724_s0, 128, %s21_s10, [#allocation3]  }
  0x34   :  { %s600_s29 = smov [#allocation7]   ;;  %s601_s6 = smov [#allocation10]  }
  0x35   :  { %s42_s30 = sshll.u32 %s600_s29, 4  ;;  %s64_s7 = sshll.u32 %s601_s6, 4  ;;  %s43_s30 = int_to_ptr.vmem [resolvable:$true] %s42_s30  ;;  %s65_s7 = int_to_ptr.vmem [resolvable:$true] %s64_s7 }
  0x36   :  { %s521_s11 = scalar_lea.hbm %s726_s2, 16 }
  0x37   :  { %p522_p10 = scmp.ne.s32.totalorder %s726_s2, %s521_s11  ;;  %p525_p11 = scmp.lt.u32.totalorder %s521_s11, %s726_s2 }
  0x39   :  { %p527_p12 = pnand %p525_p11, %p522_p10 }
  0x3b   :  { %530 = shalt.err (!%p527_p12)
}
  0x3c   :  { %s531_s0 = scalar_lea.vmem %s43_s30, 16  ;;  %s535_s10 = scalar_lea.vmem %s43_s30, 32 }
  0x3d   :  { %p532_p13 = scmp.ne.s32.totalorder %s43_s30, %s531_s0  ;;  %p536_p0 = scmp.lt.s32.totalorder %s43_s30, %s43_s30 }
  0x3e   :  { %p537_p1 = scmp.lt.s32.totalorder %s535_s10, %s531_s0 }
  0x40   :  { %p538_p2 = por %p537_p1, %p536_p0 }
  0x42   :  { %p539_p3 = pnand %p538_p2, %p532_p13 }
  0x44   :  { %542 = shalt.err (!%p539_p3)
}
  0x45   :  { %45 = dma.hbm_to_vmem [thread:$0]  %s726_s2, 16, %s43_s30, [#allocation6]  }
  0x46   :  { %s543_s19 = scalar_lea.hbm %s728_s4, 16 }
  0x47   :  { %p544_p4 = scmp.ne.s32.totalorder %s728_s4, %s543_s19  ;;  %p547_p5 = scmp.lt.u32.totalorder %s543_s19, %s728_s4 }
  0x49   :  { %p549_p6 = pnand %p547_p5, %p544_p4 }
  0x4b   :  { %552 = shalt.err (!%p549_p6)
}
  0x4c   :  { %s553_s24 = scalar_lea.vmem %s65_s7, 16  ;;  %s557_s25 = scalar_lea.vmem %s65_s7, 32 }
  0x4d   :  { %p554_p7 = scmp.ne.s32.totalorder %s65_s7, %s553_s24  ;;  %p558_p8 = scmp.lt.s32.totalorder %s65_s7, %s65_s7 }
  0x4e   :  { %p559_p9 = scmp.lt.s32.totalorder %s557_s25, %s553_s24 }
  0x50   :  { %p560_p10 = por %p559_p9, %p558_p8 }
  0x52   :  { %p561_p11 = pnand %p560_p10, %p554_p7 }
  0x54   :  { %564 = shalt.err (!%p561_p11)
}
  0x55   :  { %67 = dma.hbm_to_vmem [thread:$0]  %s728_s4, 16, %s65_s7, [#allocation9]  }
  0x56   :  { %587 = dma.done.wait [#allocation3], 128  }
  0x57   :  { %588 = vsyncadd [#allocation3], 4294967168 }
  0x58   :  { %589 = dma.done.wait [#allocation6], 2064  }
  0x59   :  { %590 = vsyncadd [#allocation6], 4294965232 }
  0x5a   :  { %591 = dma.done.wait [#allocation9], 2064  }
  0x5b   :  { %592 = vsyncadd [#allocation9], 4294965232  ;;  %v602_v0 = vmov 0.0|0.0   ;;  %vm603_vm0 = vmmov 0   ;;  %v604_v1 = vmov 0.0   ;;  %v84_v2 = vld [vmem:[#allocation5] sm:$0xff] }
  0x5c   :  { %396 = vmatprep.subr.bf16.mxu0 %v602_v0  ;;  %358 = vmatprep.mubr.msk.f32.mxu0 %vm603_vm0, %v604_v1  ;;  %v85_v3 = vld [vmem:[#allocation5 + $0x8] sm:$0xff]  ;;  %v86_v4 = vld [vmem:[#allocation5 + $0x10] sm:$0xff]  ;;  %v87_v6 = vld [vmem:[#allocation5 + $0x18] sm:$0xff]  ;;  %s605_s4 = smov [#allocation11]  }
  0x5d   :  { %420 = vmatprep.subr.bf16.mxu1 %v602_v0  ;;  %393 = vmatprep.mubr.msk.f32.mxu1 %vm603_vm0, %v604_v1  ;;  %v397_v5 = vpack.c.bf16 %v85_v3, %v84_v2  ;;  %v400_v7 = vpack.c.bf16 %v87_v6, %v86_v4  ;;  %v88_v8 = vld [vmem:[#allocation5 + $0x20] sm:$0xff]  ;;  %v89_v9 = vld [vmem:[#allocation5 + $0x28] sm:$0xff]  ;;  %v180_v12 = vld [vmem:[#allocation8 + $0x10] sm:$0xff]  ;;  %s279_s27 = sshll.u32 %s605_s4, 4  ;;  %s280_s27 = int_to_ptr.vmem [resolvable:$true] %s279_s27 }
  0x5e   :  { %v178_v10 = vld [vmem:[#allocation8] sm:$0xff]  ;;  %v179_v11 = vld [vmem:[#allocation8 + $0x8] sm:$0xff]  ;;  %v181_v13 = vld [vmem:[#allocation8 + $0x18] sm:$0xff]  ;;  %v403_v14 = vpack.c.bf16 %v89_v9, %v88_v8  ;;  %s565_s3 = scalar_lea.vmem %s280_s27, 128  ;;  %p570_p13 = scmp.lt.s32.totalorder %s280_s27, %s280_s27 }
  0x5f   :  { %398 = vmatpush3.bf16.msra.mxu0 %v397_v5  ;;  %v421_v15 = vpack.c.bf16 %v179_v11, %v178_v10  ;;  %v90_v16 = vld [vmem:[#allocation5 + $0x30] sm:$0xff]  ;;  %v91_v17 = vld [vmem:[#allocation5 + $0x38] sm:$0xff]  ;;  %v424_v18 = vpack.c.bf16 %v181_v13, %v180_v12  ;;  %v182_v19 = vld [vmem:[#allocation8 + $0x20] sm:$0xff]  ;;  %p566_p12 = scmp.ne.s32.totalorder %s280_s27, %s565_s3  ;;  %p571_p0 = scmp.lt.s32.totalorder %s565_s3, %s565_s3 }
  0x60   :  { %399 = vmatprep.subr.bf16.mxu0 %v602_v0  ;;  %v183_v20 = vld [vmem:[#allocation8 + $0x28] sm:$0xff]  ;;  %v406_v21 = vpack.c.bf16 %v91_v17, %v90_v16  ;;  %v92_v22 = vld [vmem:[#allocation5 + $0x40] sm:$0xff]  ;;  %v184_v25 = vld [vmem:[#allocation8 + $0x30] sm:$0xff] }
  0x61   :  { %422 = vmatpush3.bf16.msra.mxu1 %v421_v15  ;;  %v93_v23 = vld [vmem:[#allocation5 + $0x48] sm:$0xff]  ;;  %v427_v24 = vpack.c.bf16 %v183_v20, %v182_v19  ;;  %v185_v26 = vld [vmem:[#allocation8 + $0x38] sm:$0xff]  ;;  %v94_v28 = vld [vmem:[#allocation5 + $0x50] sm:$0xff]  ;;  %p572_p1 = por %p571_p0, %p570_p13 }
  0x62   :  { %423 = vmatprep.subr.bf16.mxu1 %v602_v0  ;;  %v409_v27 = vpack.c.bf16 %v93_v23, %v92_v22  ;;  %v95_v29 = vld [vmem:[#allocation5 + $0x58] sm:$0xff]  ;;  %v430_v30 = vpack.c.bf16 %v185_v26, %v184_v25  ;;  %v186_v31 = vld [vmem:[#allocation8 + $0x40] sm:$0xff]  ;;  %v187_v32 = vld [vmem:[#allocation8 + $0x48] sm:$0xff] }
  0x63   :  { %401 = vmatpush3.bf16.msra.mxu0 %v400_v7  ;;  %v412_v33 = vpack.c.bf16 %v95_v29, %v94_v28  ;;  %v96_v34 = vld [vmem:[#allocation5 + $0x60] sm:$0xff]  ;;  %v97_v35 = vld [vmem:[#allocation5 + $0x68] sm:$0xff]  ;;  %v433_v36 = vpack.c.bf16 %v187_v32, %v186_v31  ;;  %v188_v37 = vld [vmem:[#allocation8 + $0x50] sm:$0xff]  ;;  %p573_p2 = pnand %p572_p1, %p566_p12 }
  0x64   :  { %402 = vmatprep.subr.bf16.mxu0 %v602_v0  ;;  %v189_v38 = vld [vmem:[#allocation8 + $0x58] sm:$0xff]  ;;  %v415_v39 = vpack.c.bf16 %v97_v35, %v96_v34  ;;  %v98_v40 = vld [vmem:[#allocation5 + $0x70] sm:$0xff]  ;;  %v190_v43 = vld [vmem:[#allocation8 + $0x60] sm:$0xff] }
  0x65   :  { %425 = vmatpush3.bf16.msra.mxu1 %v424_v18  ;;  %v99_v41 = vld [vmem:[#allocation5 + $0x78] sm:$0xff]  ;;  %v436_v42 = vpack.c.bf16 %v189_v38, %v188_v37  ;;  %v191_v44 = vld [vmem:[#allocation8 + $0x68] sm:$0xff]  ;;  %v290_v51 = vld [vmem:[#allocation7] ss:$0 sm:$0xff] }
  0x66   :  { %426 = vmatprep.subr.bf16.mxu1 %v602_v0  ;;  %v418_v45 = vpack.c.bf16 %v99_v41, %v98_v40  ;;  %v439_v46 = vpack.c.bf16 %v191_v44, %v190_v43  ;;  %v83_v47 = vld [vmem:[#allocation2] sm:$0xff]  ;;  %v291_v56 = vld [vmem:[#allocation10] ss:$0 sm:$0xff] }
  0x67   :  { %404 = vmatpush3.bf16.msra.mxu0 %v403_v14  ;;  %v192_v48 = vld [vmem:[#allocation8 + $0x70] sm:$0xff]  ;;  %v193_v49 = vld [vmem:[#allocation8 + $0x78] sm:$0xff] }
  0x68   :  { %405 = vmatprep.subr.bf16.mxu0 %v602_v0  ;;  %v442_v50 = vpack.c.bf16 %v193_v49, %v192_v48 }
  0x69   :  { %428 = vmatpush3.bf16.msra.mxu1 %v427_v24 }
  0x6a   :  { %429 = vmatprep.subr.bf16.mxu1 %v602_v0 }
  0x6b   :  { %407 = vmatpush3.bf16.msra.mxu0 %v406_v21 }
  0x6c   :  { %408 = vmatprep.subr.bf16.mxu0 %v602_v0 }
  0x6d   :  { %431 = vmatpush3.bf16.msra.mxu1 %v430_v30 }
  0x6e   :  { %432 = vmatprep.subr.bf16.mxu1 %v602_v0 }
  0x6f   :  { %410 = vmatpush3.bf16.msra.mxu0 %v409_v27 }
  0x70   :  { %411 = vmatprep.subr.bf16.mxu0 %v602_v0 }
  0x71   :  { %434 = vmatpush3.bf16.msra.mxu1 %v433_v36 }
  0x72   :  { %435 = vmatprep.subr.bf16.mxu1 %v602_v0 }
  0x73   :  { %413 = vmatpush3.bf16.msra.mxu0 %v412_v33 }
  0x74   :  { %414 = vmatprep.subr.bf16.mxu0 %v602_v0 }
  0x75   :  { %437 = vmatpush3.bf16.msra.mxu1 %v436_v42 }
  0x76   :  { %438 = vmatprep.subr.bf16.mxu1 %v602_v0 }
  0x77   :  { %416 = vmatpush3.bf16.msra.mxu0 %v415_v39 }
  0x78   :  { %417 = vmatprep.subr.bf16.mxu0 %v602_v0 }
  0x79   :  { %440 = vmatpush3.bf16.msra.mxu1 %v439_v46 }
  0x7a   :  { %441 = vmatprep.subr.bf16.mxu1 %v602_v0 }
  0x7b   :  { %419 = vmatpush3.bf16.msra.mxu0 %v418_v45 }
  0x7d   :  { %443 = vmatpush3.bf16.msra.mxu1 %v442_v50 }
  0x7e   :  { %359 = vmatmul.mubr.f32.vlgmr.msra.gmra.mrb[0].mxu0 %v83_v47 }
 0x151   :  { %v173_v52 = vpop.f32.mrb[0].mxu0 }
 0x152   :  { %v174_v53 = vadd.f32 %v290_v51, %v173_v52  ;;  %v360_v54 = vpop.f32.mrb[1].mxu0 }
 0x154   :  { %v177_v55 = vmax.f32 %v174_v53, 0.0 }
 0x156   :  { %394 = vmatmul.mubr.f32.vlgmr.msra.gmra.mrb[0].mxu1 %v177_v55 }
 0x229   :  { %v267_v57 = vpop.f32.mrb[0].mxu1 }
 0x22a   :  { %v268_v58 = vadd.f32 %v291_v56, %v267_v57  ;;  %v395_v59 = vpop.f32.mrb[1].mxu1 }
 0x22c   :  { %v271_v60 = vadd.f32 %v268_v58, %v83_v47 }
 0x22e   :  { %272 = vst [vmem:[#allocation11] sm:$0xff] %v271_v60 }
 0x22f   :  { %576 = shalt.err (!%p573_p2)
}
 0x230   :  { %s577_s30 = scalar_lea.hbm %s729_s5, 128 }
 0x231   :  { %p578_p3 = scmp.ne.s32.totalorder %s729_s5, %s577_s30  ;;  %p581_p4 = scmp.lt.u32.totalorder %s577_s30, %s729_s5 }
 0x233   :  { %p583_p5 = pnand %p581_p4, %p578_p3 }
 0x235   :  { %586 = shalt.err (!%p583_p5)
}
 0x236   :  { %282 = dma.vmem_to_hbm [thread:$0]  %s280_s27, 128, %s729_s5, [#allocation4]  }
 0x237   :  { %593 = dma.done.wait [#allocation4], 128  }
 0x238   :  { %594 = vsyncadd [#allocation4], 4294967168 }
 0x239   :  { %286 = vsyncpa [#allocation3], 1 }
 0x23a   :  { %287 = vsyncpa [#allocation6], 1 }
 0x23b   :  { %288 = vsyncpa [#allocation9], 1 }
 0x23c   :  { %289 = vsyncpa [#allocation4], 1 }

</bundles_post_ra>
